<compile_context>
chip_gen: v6e
topology: v6e:2x2x1
jax: 0.10.0
libtpu: 0.0.40
codegen_flags: <defaults>
</compile_context>

<pallas_src>
import jax
import jax.numpy as jnp
from jax.experimental import pallas as pl
from jax.experimental.pallas import tpu as pltpu


def _patch_embed_kernel(x_ref, w_ref, b_ref, o_ref):
    # x_ref: (TM, K) streamed patch tile; w_ref: (K, E_pad) VMEM-resident;
    # b_ref: (1, E_pad) f32 VMEM-resident; o_ref: (TM, E_pad).
    acc = jnp.dot(x_ref[...], w_ref[...], preferred_element_type=jnp.float32)
    o_ref[...] = (acc + b_ref[...]).astype(o_ref.dtype)


def _round_up(v, m):
    return -(-v // m) * m


def _choose_tile_m(M, tm_max):
    """Pick TM dividing M exactly (no pad / no post-slice).

    Prefers: multiple of 8 (sublane-aligned blocks), grid >= 2 (megacore /
    2 TCs on v7x), an even number of grid steps, and the largest tile that
    meets those. Returns (TM, need_m_pad)."""
    upper = min(tm_max, M)
    divs = [t for t in range(upper, 0, -1)
            if M % t == 0 and (t % 8 == 0 or t == M)]
    if not divs:  # M > tm_max and no usable divisor <= tm_max: fall back to padding
        return max(8, (min(tm_max, M) // 8) * 8), True
    ge2 = [t for t in divs if M // t >= 2]
    if not ge2:   # tiny M: single grid step (TM == M is always block-legal)
        return divs[0], False
    best = ge2[0]
    even = [t for t in ge2 if (M // t) % 2 == 0]
    if even and even[0] >= max(best // 2, 8):
        best = even[0]  # even step count unless it shrinks the tile > 2x
    return best, False


def _physical_vmem_bytes():
    try:
        info = pltpu.get_tpu_info()
        v = int(getattr(info, "vmem_capacity_bytes", 0) or 0)
        if v > 0:
            return v
    except Exception:
        pass
    return 64 * 1024 * 1024  # conservative (v7x-sized) fallback


def patch_embedding(x, weight, bias, patch_size, *,
                    compute_dtype=jnp.bfloat16, out_dtype=None,
                    tm=None, input_buffers=2):
    """x: (B,C,H,W) NCHW, weight: (E,C,P,P), bias: (E,) -> (B, n_patches, E)."""
    B, C, H, W = x.shape
    E = weight.shape[0]
    P = int(patch_size)
    assert H % P == 0 and W % P == 0, (
        f"image ({H},{W}) must be divisible by patch_size {P}")
    hp, wp = H // P, W // P
    n_patches = hp * wp
    if out_dtype is None:
        # Perf default: emit compute_dtype (bf16) — cuts output HBM traffic.
        out_dtype = compute_dtype if compute_dtype is not None else x.dtype

    # --- wrapper glue: im2col (one fused XLA transpose+cast copy).
    # (B, C, hp, P, wp, P) -> (B, hp, wp, C, P, P) -> (B*n_patches, C*P*P)
    patches = x.reshape(B, C, hp, P, wp, P).transpose(0, 2, 4, 1, 3, 5)
    patches = patches.reshape(B * n_patches, C * P * P)
    # conv weight (E, C, P, P) -> (C*P*P, E); bias as (1, E) f32.
    w_mat = weight.reshape(E, C * P * P).T
    b_mat = bias.reshape(1, E).astype(jnp.float32)

    if compute_dtype is not None:
        patches = patches.astype(compute_dtype)
        w_mat = w_mat.astype(compute_dtype)

    M, K = patches.shape

    # K alignment: pad ragged K (>= one lane tile) up to a multiple of 128 so
    # input loads are lane-dense and MXU passes aren't ragged (exact zero-pad).
    if K >= 128 and K % 128 != 0:
        K_pad = _round_up(K, 128)
        patches = jnp.pad(patches, ((0, 0), (0, K_pad - K)))
        w_mat = jnp.pad(w_mat, ((0, K_pad - K), (0, 0)))
        K = K_pad

    # E alignment: pad to a multiple of 128 for lane-dense (unmasked) stores.
    E_pad = _round_up(E, 128)
    if E_pad != E:
        w_mat = jnp.pad(w_mat, ((0, 0), (0, E_pad - E)))
        b_mat = jnp.pad(b_mat, ((0, 0), (0, E_pad - E)))

    # --- per-generation tile sizing from physical VMEM.
    phys_vmem = _physical_vmem_bytes()
    x_bytes = patches.dtype.itemsize
    w_bytes = w_mat.dtype.itemsize
    o_bytes = jnp.dtype(out_dtype).itemsize

    tm_max = int(tm) if tm is not None else (4096 if phys_vmem >= (96 << 20)
                                             else 2048)
    while True:
        TM, need_m_pad = _choose_tile_m(M, tm_max)
        # resident W + double-buffered in/out tiles + f32 matmul temp + bias
        vmem_budget = (K * E_pad * w_bytes
                       + 2 * TM * K * x_bytes
                       + 2 * TM * E_pad * o_bytes
                       + TM * E_pad * 4
                       + 2 * E_pad * 4)
        if vmem_budget <= int(phys_vmem * 0.6) or tm_max <= 256:
            break
        tm_max //= 2

    M_run = M
    if need_m_pad:
        M_run = _round_up(M, TM)
        patches = jnp.pad(patches, ((0, M_run - M), (0, 0)))
    grid = (M_run // TM,)

    headroom_cap = int(phys_vmem * 0.78)          # leave compiler scratch room
    vmem_limit = int(min(max(2 * vmem_budget, 32 << 20), headroom_cap))
    vmem_limit = max(vmem_limit, min(vmem_budget + (4 << 20), headroom_cap))

    patch_spec_kwargs = {}
    if input_buffers is not None and int(input_buffers) > 2:
        # Only used when explicitly requested (exposed-DMA case from a trace).
        patch_spec_kwargs["pipeline_mode"] = pl.Buffered(int(input_buffers))

    in_specs = [
        pl.BlockSpec((TM, K), lambda i: (i, 0), **patch_spec_kwargs),  # streamed
        pl.BlockSpec((K, E_pad), lambda i: (0, 0)),                    # resident W
        pl.BlockSpec((1, E_pad), lambda i: (0, 0)),                    # resident b
    ]

    out = pl.pallas_call(
        _patch_embed_kernel,
        out_shape=jax.ShapeDtypeStruct((M_run, E_pad), out_dtype),
        grid_spec=pltpu.PrefetchScalarGridSpec(
            num_scalar_prefetch=0,
            grid=grid,
            in_specs=in_specs,
            out_specs=pl.BlockSpec((TM, E_pad), lambda i: (i, 0)),
        ),
        compiler_params=pltpu.CompilerParams(
            dimension_semantics=("parallel",),        # megacore / 2 TCs on v7x
            vmem_limit_bytes=vmem_limit,
            allow_input_fusion=[True, False, False],  # let im2col fuse into DMA
        ),
    )(patches, w_mat, b_mat)

    if need_m_pad or E_pad != E:
        out = out[:M, :E]
    return out.reshape(B, n_patches, E)


if __name__ == "__main__":
    # Small shapes: image_size=16, patch_size=4, in_channels=4, embedding_dim=32
    B, C, H, W = 2, 4, 16, 16
    P = 4
    E = 32

    key = jax.random.PRNGKey(0)
    kx, kw, kb = jax.random.split(key, 3)
    x = jax.random.normal(kx, (B, C, H, W), dtype=jnp.float32)
    weight = jax.random.normal(kw, (E, C, P, P), dtype=jnp.float32) * 0.02
    bias = jax.random.normal(kb, (E,), dtype=jnp.float32) * 0.02

    out = patch_embedding(x, weight, bias, P)
    out = jax.block_until_ready(out)

    # Reference: plain-JAX conv (same semantics as nn.Conv2d kernel=stride=P).
    # Tolerance loosened because the kernel uses bf16 inputs/output with f32
    # accumulation (pass compute_dtype=None for an f32-parity run).
    ref = jax.lax.conv_general_dilated(
        x, weight, window_strides=(P, P), padding="VALID",
        dimension_numbers=("NCHW", "OIHW", "NCHW"),
    ) + bias.reshape(1, E, 1, 1)
    ref = ref.reshape(B, E, -1).transpose(0, 2, 1)

    assert out.shape == (B, (H // P) * (W // P), E)
    assert jnp.allclose(out.astype(jnp.float32), ref, atol=5e-2, rtol=5e-2)

    print("KERNEL_OK")
</pallas_src>

<mosaic_0001>
module attributes {stable_mosaic.version = 11 : i64} {
  func.func @_patch_embed_kernel(%arg0: i32, %arg1: memref<16x64xbf16, #tpu.memory_space<vmem>>, %arg2: memref<64x128xbf16, #tpu.memory_space<vmem>>, %arg3: memref<1x128xf32, #tpu.memory_space<vmem>>, %arg4: memref<16x128xbf16, #tpu.memory_space<vmem>>) attributes {dimension_semantics = [#tpu.dimension_semantics<parallel>], iteration_bounds = array<i64: 2>, scalar_prefetch = 0 : i64, scratch_operands = 0 : i64, tpu.core_type = #tpu.core_type<tc>, window_params = [{transform_indices = @transform_0, window_bounds = array<i64: 16, 64>}, {pipeline_mode = #tpu.pipeline_mode<synchronous>, transform_indices = @transform_1, window_bounds = array<i64: 64, 128>}, {pipeline_mode = #tpu.pipeline_mode<synchronous>, transform_indices = @transform_2, window_bounds = array<i64: 1, 128>}, {transform_indices = @transform_3, window_bounds = array<i64: 16, 128>}]} {
    %c0 = arith.constant 0 : index
    %c0_0 = arith.constant 0 : index
    %0 = vector.load %arg1[%c0, %c0_0] : memref<16x64xbf16, #tpu.memory_space<vmem>>, vector<16x64xbf16>
    %c0_1 = arith.constant 0 : index
    %c0_2 = arith.constant 0 : index
    %1 = vector.load %arg2[%c0_1, %c0_2] : memref<64x128xbf16, #tpu.memory_space<vmem>>, vector<64x128xbf16>
    %cst = arith.constant dense<0.000000e+00> : vector<16x128xf32>
    %2 = tpu.matmul %0, %1, %cst {dimension_numbers = #tpu.dot_dimension_numbers<[1], [0], [0], [1], [0, 0, 1, 1], [], []>} : vector<16x64xbf16>, vector<64x128xbf16>, vector<16x128xf32> -> vector<16x128xf32>
    %c0_3 = arith.constant 0 : index
    %c0_4 = arith.constant 0 : index
    %3 = vector.load %arg3[%c0_3, %c0_4] : memref<1x128xf32, #tpu.memory_space<vmem>>, vector<1x128xf32>
    %4 = vector.broadcast %3 : vector<1x128xf32> to vector<16x128xf32>
    %5 = arith.addf %2, %4 : vector<16x128xf32>
    %6 = arith.truncf %5 : vector<16x128xf32> to vector<16x128xbf16>
    %c0_5 = arith.constant 0 : index
    %c0_6 = arith.constant 0 : index
    %7 = vector.load %arg4[%c0_5, %c0_6] : memref<16x128xbf16, #tpu.memory_space<vmem>>, vector<16x128xbf16>
    tpu.vector_store %arg4[%c0_5, %c0_6], %6 {strides = array<i32>} : memref<16x128xbf16, #tpu.memory_space<vmem>>, vector<16x128xbf16>,
    return
  }
  func.func @transform_0(%arg0: i32) -> (i32, i32) {
    %c0_i32 = arith.constant 0 : i32
    %c0_i32_0 = arith.constant 0 : i32
    return %arg0, %c0_i32 : i32, i32
  }
  func.func @transform_1(%arg0: i32) -> (i32, i32) {
    %c0_i32 = arith.constant 0 : i32
    %c0_i32_0 = arith.constant 0 : i32
    %c0_i32_1 = arith.constant 0 : i32
    return %c0_i32, %c0_i32_0 : i32, i32
  }
  func.func @transform_2(%arg0: i32) -> (i32, i32) {
    %c0_i32 = arith.constant 0 : i32
    %c0_i32_0 = arith.constant 0 : i32
    %c0_i32_1 = arith.constant 0 : i32
    return %c0_i32, %c0_i32_0 : i32, i32
  }
  func.func @transform_3(%arg0: i32) -> (i32, i32) {
    %c0_i32 = arith.constant 0 : i32
    %c0_i32_0 = arith.constant 0 : i32
    return %arg0, %c0_i32 : i32, i32
  }
}

</mosaic_0001>

<bundles_post_ra>
// kernel: tpu_custom_call.1
= control target key start
LH: loop header
LB: loop body
LE: loop exit
PB: predicated region body
PF: predicated region fallthrough
CT: control target
= control target key end

     0   :  { %8 = vsyncpa [#allocation3], 0  ;;  %s863_s0 = inlined_call_operand.hbm [shape: bf16[32,64], index: 0, kind: input, shape index: {}]   ;;  %s864_s1 = inlined_call_operand.hbm [shape: bf16[64,128], index: 1, kind: input, shape index: {}]   ;;  %s865_s2 = inlined_call_operand.vmem [shape: f32[1,128], index: 2, kind: input, shape index: {}]   ;;  %s866_s3 = inlined_call_operand.hbm [shape: bf16[32,128], index: 3, kind: output, shape index: {}]  }
   0x1   :  { %10 = vsyncpa [#allocation3 + $0x1], 0 }
   0x2   :  { %11 = vsyncpa [#allocation6], 0 }
   0x3   :  { %12 = vsyncpa [#allocation4], 0 }
   0x4   :  { %14 = vsyncpa [#allocation4 + $0x1], 0  ;;  %s677_s12 = smov 0   ;;  %s679_s13 = smov 0  }
   0x5   :  { %s681_s14 = smov 0   ;;  %s683_s15 = smov 0  }
   0x6 LB: > { %s698_s16 = sadd.s32 4294967295, %s646_s15   ;;  %s405_s17 = sadd.s32 4294967294, %s646_s15   ;;  %s646_s15 = sphi %s683_s15, %s888_s15   ;;  %s642_s14 = sphi %s681_s14, %s887_s14   ;;  %s638_s13 = sphi %s679_s13, %s886_s13   ;;  %s634_s12 = sphi %s677_s12, %s885_s12  }
   0x7   : > { %p40_p0 = scmp.ne.s32.totalorder %s638_s13, %s634_s12  ;;  %p867_p1 = scmp.eq.s32.totalorder %s698_s16, 0 }
   0x8   : > { %p112_p3 = scmp.eq.s32.totalorder %s405_s17, 1  ;;  %p406_p5 = scmp.ge.s32.totalorder %s646_s15, 1 }
   0x9   : > { %p707_p4 = por %p867_p1, %p40_p0  ;;  %p119_p7 = scmp.lt.s32.totalorder %s646_s15, 3 }
   0xa   : > { %p712_p6 = por %p112_p3, %p40_p0  ;;  %s648_s21 = smov [#allocation5]  }
   0xb   : > { %s871_s18 = scalar_select %p707_p4, 1, 0 }
   0xc   : > { %s872_s19 = scalar_select %p712_p6, 1, 0 }
   0xd   : > { %p717_p8 = pnand %p406_p5, %p119_p7  ;;  %s131_s22 = sshll.u32 %s648_s21, 4  ;;  %s132_s22 = int_to_ptr.vmem [resolvable:$true] %s131_s22 }
   0xe   : > { %s731_s24 = sadd.s32 1, %s646_s15   ;;  %s27_s25 = sadd.s32 1, %s642_s14 }
   0xf   : > { %s873_s20 = scalar_select %p717_p8, 1, 0 }
  0x10   : > { %p464_p9 = pneg %p717_p8  ;;  %s24_s26 = ssub.s32 %s646_s15, %s731_s24 }
  0x11   : > { %s535_s27 = scalar_lea.vmem %s132_s22, 512  ;;  %p543_p5 = scmp.lt.s32.totalorder %s132_s22, %s132_s22 }
  0x12   : > { %p726_p11 = pnand %p464_p9, %p867_p1  ;;  %p536_p13 = scmp.ne.s32.totalorder %s132_s22, %s535_s27 }
  0x13   : > { %p544_p7 = scmp.lt.s32.totalorder %s535_s27, %s535_s27 }
  0x14   : > { %p526_p12 = pneg %p726_p11 }
  0x15   : > { %p545_p10 = por %p544_p7, %p543_p5 }
  0x16   : > { %p538_p0 = pnand %p536_p13, %p526_p12 }
  0x18   : > { %p539_p3 = pneg %p538_p0 }
  0x1a   : > { %p546_p2 = pnand %p545_p10, %p539_p3 }
  0x1c   : > { %549 = shalt.err (!%p546_p2)
}
  0x1d   : > { %s649_s28 = smov 64   ;;  %s650_s29 = smov 4  }
  0x1e   : > { %467 = dma.hbm_to_vmem [thread:$0]  (!%p726_p11), %s864_s1, 512, %s132_s22, [#allocation6], %s649_s28, %s649_s28, %s650_s29  }
  0x1f   : > { %p25_p2 = scmp.eq.s32.totalorder %s24_s26, 0  ;;  %p34_p9 = scmp.ne.s32.totalorder %s642_s14, %s638_s13 }
  0x20   : > { %p35_p10 = scmp.eq.s32.totalorder %s646_s15, 0  ;;  %p477_p12 = scmp.lt.s32.totalorder %s646_s15, 2 }
  0x21   : > { %s751_s5 = scalar_select %p25_p2, %s642_s14, %s27_s25  }
  0x22   : > { %p36_p13 = por %p35_p10, %p34_p9  ;;  %p875_p0 = scmp.eq.s32.totalorder %s698_s16, 1 }
  0x23   : > { %s148_s7 = sand.u32 1, %s642_s14   ;;  %s430_s8 = sshll.u32 %s646_s15, 7 }
  0x24   : > { %p755_p3 = por %p875_p0, %p34_p9  ;;  %s409_s9 = sshll.u32 %s148_s7, 3 }
  0x25   : > { %s764_s17 = scalar_lea.hbm %s863_s0, %s430_s8  ;;  %s152_s21 = scalar_lea.vmem [#allocation2], %s409_s9 }
  0x26   : > { %s876_s6 = scalar_select %p755_p3, 1, 0 }
  0x27   : > { %s159_s22 = sshll.u32 %s152_s21, 4  ;;  %p766_p11 = pnand %p477_p12, %p36_p13  ;;  %s770_s22 = int_to_ptr.vmem [resolvable:$true] %s159_s22 }
  0x28   : > { %s772_s25 = scalar_lea.sflag [#allocation3], %s148_s7  ;;  %s550_s26 = scalar_lea.hbm %s764_s17, 128 }
  0x29   : > { %p551_p5 = scmp.ne.s32.totalorder %s764_s17, %s550_s26  ;;  %p552_p7 = pneg %p766_p11 }
  0x2a   : > { %s555_s4 = scalar_lea.hbm %s863_s0, 256  ;;  %p556_p10 = scmp.lt.s32.totalorder %s764_s17, %s863_s0 }
  0x2b   : > { %p553_p2 = pnand %p552_p7, %p551_p5  ;;  %p557_p12 = scmp.lt.s32.totalorder %s555_s4, %s550_s26 }
  0x2d   : > { %p554_p9 = pneg %p553_p2  ;;  %p558_p13 = por %p557_p12, %p556_p10 }
  0x2f   : > { %p559_p0 = pnand %p558_p13, %p554_p9 }
  0x31   : > { %562 = shalt.err (!%p559_p0)
}
  0x32   : > { %s563_s7 = scalar_lea.vmem %s770_s22, 128  ;;  %s651_s10 = smov [#allocation2]  }
  0x33   : > { %p564_p1 = scmp.ne.s32.totalorder %s770_s22, %s563_s7  ;;  %s568_s11 = sshll.u32 %s651_s10, 4  ;;  %s569_s11 = int_to_ptr.vmem [resolvable:$false] %s568_s11 }
  0x34   : > { %s570_s21 = scalar_lea.vmem %s569_s11, 256  ;;  %p571_p2 = scmp.lt.s32.totalorder %s770_s22, %s569_s11 }
  0x35   : > { %p566_p6 = pnand %p564_p1, %p552_p7  ;;  %p572_p3 = scmp.lt.s32.totalorder %s570_s21, %s563_s7 }
  0x37   : > { %p567_p5 = pneg %p566_p6  ;;  %p573_p4 = por %p572_p3, %p571_p2 }
  0x39   : > { %p574_p8 = pnand %p573_p4, %p567_p5 }
  0x3b   : > { %577 = shalt.err (!%p574_p8)
}
  0x3c   : > { %471 = dma.hbm_to_vmem [thread:$0]  (!%p766_p11), %s764_s17, 128, %s770_s22, %s772_s25, %s649_s28, %s649_s28, %s650_s29  }
  0x3d   : > { %p878_p1 = scmp.ne.s32.totalorder %s873_s20, 0 }
  0x3e   : > { %s799_s26 = sand.u32 (!%p878_p1), 1, %s638_s13   ;;  %p879_p4 = scmp.ne.s32.totalorder (!%p878_p1), %s871_s18, 0 }
  0x3f   : > { %171 = sbr.rel (%p878_p1) target bundleno = 304 (0x130), region = 32  ;;  %s413_s27 = sshll.u32 (!%p878_p1), %s799_s26, 3 }
  0x40   : > { %s174_s30 = scalar_lea.sflag (!%p878_p1), [#allocation3], %s799_s26  ;;  %s177_s4 = scalar_lea.vmem (!%p878_p1), [#allocation2], %s413_s27 }
  0x44   : > { %621 = dma.done.wait (%p879_p4), %s174_s30, 128  }
  0x45   : > { %623 = vsyncadd (%p879_p4), %s174_s30, 4294967168  ;;  %p880_p6 = scmp.eq.s32.totalorder %s698_s16, 0 }
  0x47   : > { %625 = dma.done.wait (%p880_p6), [#allocation6], 512   ;;  %p881_p8 = pmov %p880_p6 }
  0x48   : > { %v652_v0 = vmov 0.0   ;;  %vm653_vm0 = vmmov 0   ;;  %v519_v1 = vld [vmem:[#allocation5 + $0x18] sm:$0xff]   ;;  %v520_v2 = vld [vmem:[#allocation5 + $0x10] sm:$0xff]   ;;  %v521_v3 = vld [vmem:[#allocation5 + $0x8] sm:$0xff]   ;;  %vm253_vm1 = vcmask 523264  }
  0x49   : > { %627 = vsyncadd (%p881_p8), [#allocation6], 4294966784  ;;  %444 = vmatprep.subr.bf16.mxu0 %v652_v0  ;;  %452 = vmatprep.mubr.msk.bf16.mxu0 %vm653_vm0, %v652_v0  ;;  %v522_v4 = vld [vmem:[#allocation5] sm:$0xff]   ;;  %v523_v5 = vld [vmem:[%s177_s4] sm:$0xff]   ;;  %s203_s28 = scalar_lea.vmem [#allocation7], %s413_s27  ;;  %s433_s17 = sshll.u32 %s698_s16, 7 }
  0x4a   : > { %445 = vmatpush3.bf16.msra.mxu0 %v519_v1  ;;  %v416_v7 = vld [vmem:[%s865_s2] ss:$0 sm:$0xff]  ;;  %s322_s29 = sshll.u32 %s203_s28, 4  ;;  %s820_s25 = scalar_lea.hbm %s866_s3, %s433_s17  ;;  %s815_s29 = int_to_ptr.vmem [resolvable:$true] %s322_s29 }
  0x4b   : > { %446 = vmatprep.subr.bf16.mxu0 %v652_v0  ;;  %s309_s8 = scalar_lea.sflag [#allocation4], %s799_s26  ;;  %s578_s9 = scalar_lea.vmem %s815_s29, 128 }
  0x4c   : > { %p579_p3 = scmp.ne.s32.totalorder %s815_s29, %s578_s9  ;;  %p882_p11 = scmp.ne.s32.totalorder %s876_s6, 0 }
  0x4d   : > { %s654_s16 = smov [#allocation7]  }
  0x4e   : > { %447 = vmatpush3.bf16.msra.mxu0 %v520_v2  ;;  %p580_p7 = pnand %p579_p3, %p882_p11  ;;  %s582_s7 = sshll.u32 %s654_s16, 4  ;;  %s583_s7 = int_to_ptr.vmem [resolvable:$false] %s582_s7 }
  0x4f   : > { %448 = vmatprep.subr.bf16.mxu0 %v652_v0  ;;  %s584_s10 = scalar_lea.vmem %s583_s7, 256  ;;  %p585_p10 = scmp.lt.s32.totalorder %s815_s29, %s583_s7 }
  0x50   : > { %p581_p9 = pneg %p580_p7  ;;  %p586_p12 = scmp.lt.s32.totalorder %s584_s10, %s578_s9 }
  0x52   : > { %449 = vmatpush3.bf16.msra.mxu0 %v521_v3  ;;  %p587_p13 = por %p586_p12, %p585_p10 }
  0x53   : > { %450 = vmatprep.subr.bf16.mxu0 %v652_v0 }
  0x54   : > { %p588_p0 = pnand %p587_p13, %p581_p9 }
  0x56   : > { %451 = vmatpush3.bf16.msra.mxu0 %v522_v4 }
  0x59   : > { %453 = vmatmul.mubr.msk.bf16.vlgmr.msra.gmra.mxu0 %vm253_vm1, %v523_v5 }
 0x119   : > { %v291_v6 = vpop.f32.mrf.mxu0 }
 0x11a   : > { %v292_v10 = vadd.f32 %v416_v7, %v291_v6 }
 0x11b   : > { %v454_v8 = vpop.f32.mrf.mxu0 }
 0x11d   : > { %v294_v9 = vpop.f32.mrf.mxu0 }
 0x11e   : > { %v295_v11 = vadd.f32 %v416_v7, %v294_v9 }
 0x11f   : > { %v455_v12 = vpop.f32.mrf.mxu0 }
 0x120   : > { %v437_v13 = vpack.c.bf16 %v295_v11, %v292_v10 }
 0x122   : > { %438 = vst [vmem:[%s203_s28] sm:$0xff] %v437_v13  }
 0x123   : > { %591 = shalt.err (!%p588_p0)
}
 0x124   : > { %s592_s11 = scalar_lea.hbm %s820_s25, 128  ;;  %s596_s30 = scalar_lea.hbm %s866_s3, 256 }
 0x125   : > { %p593_p5 = scmp.ne.s32.totalorder %s820_s25, %s592_s11  ;;  %p597_p4 = scmp.lt.s32.totalorder %s820_s25, %s866_s3 }
 0x126   : > { %p598_p6 = scmp.lt.s32.totalorder %s596_s30, %s592_s11 }
 0x127   : > { %p594_p2 = pnand %p593_p5, %p882_p11 }
 0x128   : > { %p599_p8 = por %p598_p6, %p597_p4 }
 0x129   : > { %p595_p1 = pneg %p594_p2 }
 0x12b   : > { %p600_p3 = pnand %p599_p8, %p595_p1 }
 0x12d   : > { %603 = shalt.err (!%p600_p3)
}
 0x12e   : > { %s655_s20 = smov 64   ;;  %s656_s28 = smov 4  }
 0x12f   : > { %462 = dma.vmem_to_hbm [thread:$0]  (%p882_p11), %s815_s29, 128, %s820_s25, %s309_s8, %s655_s20, %s655_s20, %s656_s28  }
 0x130 PF: > { %s337_s17 = sand.u32 1, %s634_s12   ;;  %p883_p7 = scmp.ne.s32.totalorder %s872_s19, 0 }
 0x131   : > { %p884_p9 = scmp.ge.s32.totalorder %s646_s15, 2  ;;  %s338_s22 = scalar_lea.sflag [#allocation4], %s337_s17 }
 0x133   : > { %p473_p10 = pnand %p884_p9, %p883_p7 }
 0x135   : > { %p474_p12 = pneg %p473_p10 }
 0x137   : > { %629 = dma.done.wait (%p474_p12), %s338_s22, 128  }
 0x138   : > { %631 = vsyncadd (%p474_p12), %s338_s22, 4294967168  ;;  %p17_p13 = scmp.ge.s32.totalorder %s731_s24, 4   ;;  %s885_s12 = smov %s638_s13 }
 0x139   : > { %s886_s13 = smov %s642_s14  ;;  %s887_s14 = smov %s751_s5 }
 0x13a   : > { %s888_s15 = smov %s731_s24  ;;  %19 = sbr.rel (!%p17_p13) target bundleno = 6 (0x6), region = 81 }
 0x13f   :  { %343 = vsyncpa [#allocation3], 1 }
 0x140   :  { %345 = vsyncpa [#allocation3 + $0x1], 1 }
 0x141   :  { %346 = vsyncpa [#allocation6], 1 }
 0x142   :  { %347 = vsyncpa [#allocation4], 1 }
 0x143   :  { %349 = vsyncpa [#allocation4 + $0x1], 1 }

</bundles_post_ra>
